<compile_context>
chip_gen: v7x
topology: tpu7x:2x2x1
jax: 0.10.0
libtpu: 0.0.40
codegen_flags: <defaults>
</compile_context>

<pallas_src>
import numpy as np
import jax
import jax.numpy as jnp
from jax import lax
from jax.experimental import pallas as pl
from jax.experimental.pallas import tpu as pltpu

EPS = 1e-5  # nn.BatchNorm3d default


def _round_up(a, b):
    return (a + b - 1) // b * b


def _pick_td(N, D, H, W, tm_target=2048, min_tiles=8):
    """Depth planes per tile: TD | D, TM = TD*H*W <= tm_target, >= min_tiles tiles."""
    divs = [t for t in range(1, D + 1) if D % t == 0]
    fit = [t for t in divs if t * H * W <= tm_target] or [1]
    good = [t for t in fit if N * (D // t) >= min_tiles]
    return max(good) if good else max(fit)


def _make_kernels(H, W, TD, LPAD, K, Kpad, Cout):
    HW = H * W
    TM = TD * HW
    # Constant slab-lane offset per tap (H/W are NOT zero-padded in the slab;
    # out-of-image taps are zeroed by the mask, depth padding is real zeros).
    offs = [kd * HW + (kh - 1) * W + (kw - 1)
            for kd in range(3) for kh in range(3) for kw in range(3)]

    def build_patches(slab, mask):
        # slab: (Cin, SLABR).  For each tap, all Cin patch rows share the same
        # lane window -> 27 cheap static slices, then one sublane concat.
        pieces = [slab[:, LPAD + o: LPAD + o + TM] for o in offs]  # 27 x (Cin, TM)
        if Kpad > K:
            pieces.append(jnp.zeros((Kpad - K, TM), slab.dtype))
        return jnp.concatenate(pieces, axis=0) * mask              # (Kpad, TM)

    def stats_kernel(slab_ref, w_ref, mask_ref, sum_ref, sq_ref):
        p = build_patches(slab_ref[0, 0], mask_ref[...])
        y = jnp.dot(w_ref[...], p, preferred_element_type=jnp.float32)  # (Cp, TM)
        sum_ref[0, 0] = jnp.sum(y, axis=1, keepdims=True)
        sq_ref[0, 0] = jnp.sum(y * y, axis=1, keepdims=True)

    def out_kernel(slab_ref, w_ref, mask_ref, shift_ref, o_ref):
        p = build_patches(slab_ref[0, 0], mask_ref[...])
        # BN scale is already folded into w_ref; add shift, ReLU, store the
        # final transposed layout (Cout rows, TM lane-dense columns).
        y = jnp.dot(w_ref[...], p, preferred_element_type=jnp.float32)  # (Cp, TM)
        y = jnp.maximum(y + shift_ref[...], 0.0)
        o_ref[0] = y[:Cout, :]

    return stats_kernel, out_kernel


def conv_single_forward(x, weight, bias, gamma, beta, *, compute_dtype=jnp.float32):
    """ConvSingle.forward: Conv3d(k=3, s=1, p=1, bias) + BatchNorm3d(train) + ReLU."""
    del bias  # exactly cancelled by training-mode BN mean subtraction
    N, Cin, D, H, W = x.shape
    Cout = weight.shape[0]
    HW = H * W
    M = N * D * HW

    TD = _pick_td(N, D, H, W)
    nDT = D // TD
    TM = TD * HW
    K = 27 * Cin
    Kpad = _round_up(K, 128)
    Cp = _round_up(max(Cout, 8), 8)
    LPAD = _round_up(W + 1, 8)
    SLABR = LPAD + (TD + 2) * HW + LPAD

    # ---- cheap XLA prep: depth-pad, flatten spatial, stack per-tile halo slabs.
    xdp = jnp.pad(x.reshape(N, Cin, D, HW), ((0, 0), (0, 0), (1, 1), (0, 0)))
    xflat = jnp.pad(xdp.reshape(N, Cin, (D + 2) * HW),
                    ((0, 0), (0, 0), (LPAD, LPAD)))
    xs = jnp.stack([xflat[:, :, t * TM: t * TM + SLABR] for t in range(nDT)],
                   axis=1).astype(compute_dtype)              # (N, nDT, Cin, SLABR)

    # Weights as (Cout, 27*Cin), tap-major / channel-minor, padded to (Cp, Kpad).
    w2t = jnp.transpose(weight, (0, 2, 3, 4, 1)).reshape(Cout, K)
    w2t = jnp.pad(w2t, ((0, Cp - Cout), (0, Kpad - K)))

    # Static H/W-boundary mask for the 27 taps (identical for every tile).
    mvec = np.arange(TM)
    hh = (mvec // W) % H
    ww = mvec % W
    mask_np = np.zeros((Kpad, TM), np.float32)
    tap = 0
    for kd in range(3):
        for kh in range(3):
            for kw in range(3):
                valid = ((hh + kh - 1 >= 0) & (hh + kh - 1 < H) &
                         (ww + kw - 1 >= 0) & (ww + kw - 1 < W))
                mask_np[tap * Cin:(tap + 1) * Cin, :] = valid[None, :]
                tap += 1
    mask = jnp.asarray(mask_np, dtype=compute_dtype)

    stats_kernel, out_kernel = _make_kernels(H, W, TD, LPAD, K, Kpad, Cout)

    cparams = pltpu.CompilerParams(
        dimension_semantics=("parallel", "parallel"),
        vmem_limit_bytes=48 * 1024 * 1024)   # < v7x 64 MiB phys; per-tile use < 1 MiB

    slab_spec = pl.BlockSpec((1, 1, Cin, SLABR), lambda n, t: (n, t, 0, 0))
    w_spec = pl.BlockSpec((Cp, Kpad), lambda n, t: (0, 0))
    mask_spec = pl.BlockSpec((Kpad, TM), lambda n, t: (0, 0))

    # ---- pass 1: per-tile conv (VMEM only) -> per-channel sum / sum-of-squares.
    sums, sqs = pl.pallas_call(
        stats_kernel,
        out_shape=(jax.ShapeDtypeStruct((N, nDT, Cp, 1), jnp.float32),
                   jax.ShapeDtypeStruct((N, nDT, Cp, 1), jnp.float32)),
        grid=(N, nDT),
        in_specs=[slab_spec, w_spec, mask_spec],
        out_specs=(pl.BlockSpec((1, 1, Cp, 1), lambda n, t: (n, t, 0, 0)),
                   pl.BlockSpec((1, 1, Cp, 1), lambda n, t: (n, t, 0, 0))),
        compiler_params=cparams,
    )(xs, w2t.astype(compute_dtype), mask)

    # ---- tiny O(Cout) glue: batch stats -> BN scale folded into W, plus shift.
    sum_tot = jnp.sum(sums, axis=(0, 1))[:, 0]    # (Cp,)
    sq_tot = jnp.sum(sqs, axis=(0, 1))[:, 0]
    mean = sum_tot / M
    var = jnp.maximum(sq_tot / M - mean * mean, 0.0)
    inv = lax.rsqrt(var + EPS)
    gamma_p = jnp.pad(gamma, (0, Cp - Cout))
    beta_p = jnp.pad(beta, (0, Cp - Cout))
    scale = gamma_p * inv
    shift = (beta_p - mean * scale).reshape(Cp, 1).astype(jnp.float32)
    w2t_s = (w2t * scale[:, None]).astype(compute_dtype)

    # ---- pass 2: recompute conv with BN-scaled weights, +shift, ReLU, writing
    # the final (N, Cout, D*H*W) layout directly -> free reshape to NCDHW.
    out3 = pl.pallas_call(
        out_kernel,
        out_shape=jax.ShapeDtypeStruct((N, Cout, D * HW), jnp.float32),
        grid=(N, nDT),
        in_specs=[slab_spec, w_spec, mask_spec,
                  pl.BlockSpec((Cp, 1), lambda n, t: (0, 0))],
        out_specs=pl.BlockSpec((1, Cout, TM), lambda n, t: (n, 0, t)),
        compiler_params=cparams,
    )(xs, w2t_s, mask, shift)

    return out3.reshape(N, Cout, D, H, W)


def _reference(x, weight, bias, gamma, beta):
    """Pure-JAX reference of ConvSingle.forward (training-mode BN)."""
    Cout = weight.shape[0]
    y = lax.conv_general_dilated(
        x, weight, window_strides=(1, 1, 1), padding=((1, 1),) * 3,
        dimension_numbers=("NCDHW", "OIDHW", "NCDHW"))
    y = y + bias.reshape(1, Cout, 1, 1, 1)
    mean = jnp.mean(y, axis=(0, 2, 3, 4), keepdims=True)
    var = jnp.mean((y - mean) ** 2, axis=(0, 2, 3, 4), keepdims=True)
    y = (y - mean) * lax.rsqrt(var + EPS)
    y = y * gamma.reshape(1, Cout, 1, 1, 1) + beta.reshape(1, Cout, 1, 1, 1)
    return jnp.maximum(y, 0.0)


if __name__ == "__main__":
    # Small shapes consistent with the module's forward (5-D volumetric input).
    N, Cin, Cout, D, H, W = 2, 4, 8, 8, 8, 8
    key = jax.random.PRNGKey(0)
    kx, kw = jax.random.split(key)

    x = jax.random.normal(kx, (N, Cin, D, H, W), dtype=jnp.float32)

    # Deterministic parameter init matching the module's __init__:
    #   Conv3d weight: xavier_normal_, bias: 0; BatchNorm3d: gamma=1, beta=0.
    fan_in, fan_out = Cin * 27, Cout * 27
    xavier_std = float(np.sqrt(2.0 / (fan_in + fan_out)))
    weight = xavier_std * jax.random.normal(
        kw, (Cout, Cin, 3, 3, 3), dtype=jnp.float32)
    bias = jnp.zeros((Cout,), jnp.float32)
    gamma = jnp.ones((Cout,), jnp.float32)
    beta = jnp.zeros((Cout,), jnp.float32)

    out = jax.block_until_ready(conv_single_forward(x, weight, bias, gamma, beta))
    ref = jax.block_until_ready(_reference(x, weight, bias, gamma, beta))
    np.testing.assert_allclose(np.asarray(out), np.asarray(ref),
                               rtol=1e-4, atol=1e-4)
    print("KERNEL_OK")
</pallas_src>

<mosaic_0001>
module attributes {stable_mosaic.version = 11 : i64} {
  func.func @stats_kernel(%arg0: i32, %arg1: i32, %arg2: memref<1x1x4x288xf32, #tpu.memory_space<vmem>>, %arg3: memref<8x128xf32, #tpu.memory_space<vmem>>, %arg4: memref<128x128xf32, #tpu.memory_space<vmem>>, %arg5: memref<1x1x8x1xf32, #tpu.memory_space<vmem>>, %arg6: memref<1x1x8x1xf32, #tpu.memory_space<vmem>>) attributes {dimension_semantics = [#tpu.dimension_semantics<parallel>, #tpu.dimension_semantics<parallel>], iteration_bounds = array<i64: 2, 4>, scalar_prefetch = 0 : i64, scratch_operands = 0 : i64, tpu.core_type = #tpu.core_type<tc>, window_params = [{transform_indices = @transform_0, window_bounds = array<i64: 1, 1, 4, 288>}, {pipeline_mode = #tpu.pipeline_mode<synchronous>, transform_indices = @transform_1, window_bounds = array<i64: 8, 128>}, {pipeline_mode = #tpu.pipeline_mode<synchronous>, transform_indices = @transform_2, window_bounds = array<i64: 128, 128>}, {transform_indices = @transform_3, window_bounds = array<i64: 1, 1, 8, 1>}, {transform_indices = @transform_4, window_bounds = array<i64: 1, 1, 8, 1>}]} {
    %c0 = arith.constant 0 : index
    %c0_0 = arith.constant 0 : index
    %c0_1 = arith.constant 0 : index
    %c0_2 = arith.constant 0 : index
    %0 = vector.load %arg2[%c0, %c0_0, %c0_1, %c0_2] : memref<1x1x4x288xf32, #tpu.memory_space<vmem>>, vector<1x1x4x288xf32>
    %1 = vector.shape_cast %0 : vector<1x1x4x288xf32> to vector<4x288xf32>
    %c0_3 = arith.constant 0 : index
    %c0_4 = arith.constant 0 : index
    %2 = vector.load %arg4[%c0_3, %c0_4] : memref<128x128xf32, #tpu.memory_space<vmem>>, vector<128x128xf32>
    %3 = vector.extract_strided_slice %1 {offsets = [0, 7], sizes = [4, 128], strides = [1, 1]} : vector<4x288xf32> to vector<4x128xf32>
    %4 = vector.extract_strided_slice %1 {offsets = [0, 8], sizes = [4, 128], strides = [1, 1]} : vector<4x288xf32> to vector<4x128xf32>
    %5 = vector.extract_strided_slice %1 {offsets = [0, 9], sizes = [4, 128], strides = [1, 1]} : vector<4x288xf32> to vector<4x128xf32>
    %6 = vector.extract_strided_slice %1 {offsets = [0, 15], sizes = [4, 128], strides = [1, 1]} : vector<4x288xf32> to vector<4x128xf32>
    %7 = vector.extract_strided_slice %1 {offsets = [0, 16], sizes = [4, 128], strides = [1, 1]} : vector<4x288xf32> to vector<4x128xf32>
    %8 = vector.extract_strided_slice %1 {offsets = [0, 17], sizes = [4, 128], strides = [1, 1]} : vector<4x288xf32> to vector<4x128xf32>
    %9 = vector.extract_strided_slice %1 {offsets = [0, 23], sizes = [4, 128], strides = [1, 1]} : vector<4x288xf32> to vector<4x128xf32>
    %10 = vector.extract_strided_slice %1 {offsets = [0, 24], sizes = [4, 128], strides = [1, 1]} : vector<4x288xf32> to vector<4x128xf32>
    %11 = vector.extract_strided_slice %1 {offsets = [0, 25], sizes = [4, 128], strides = [1, 1]} : vector<4x288xf32> to vector<4x128xf32>
    %12 = vector.extract_strided_slice %1 {offsets = [0, 71], sizes = [4, 128], strides = [1, 1]} : vector<4x288xf32> to vector<4x128xf32>
    %13 = vector.extract_strided_slice %1 {offsets = [0, 72], sizes = [4, 128], strides = [1, 1]} : vector<4x288xf32> to vector<4x128xf32>
    %14 = vector.extract_strided_slice %1 {offsets = [0, 73], sizes = [4, 128], strides = [1, 1]} : vector<4x288xf32> to vector<4x128xf32>
    %15 = vector.extract_strided_slice %1 {offsets = [0, 79], sizes = [4, 128], strides = [1, 1]} : vector<4x288xf32> to vector<4x128xf32>
    %16 = vector.extract_strided_slice %1 {offsets = [0, 80], sizes = [4, 128], strides = [1, 1]} : vector<4x288xf32> to vector<4x128xf32>
    %17 = vector.extract_strided_slice %1 {offsets = [0, 81], sizes = [4, 128], strides = [1, 1]} : vector<4x288xf32> to vector<4x128xf32>
    %18 = vector.extract_strided_slice %1 {offsets = [0, 87], sizes = [4, 128], strides = [1, 1]} : vector<4x288xf32> to vector<4x128xf32>
    %19 = vector.extract_strided_slice %1 {offsets = [0, 88], sizes = [4, 128], strides = [1, 1]} : vector<4x288xf32> to vector<4x128xf32>
    %20 = vector.extract_strided_slice %1 {offsets = [0, 89], sizes = [4, 128], strides = [1, 1]} : vector<4x288xf32> to vector<4x128xf32>
    %21 = vector.extract_strided_slice %1 {offsets = [0, 135], sizes = [4, 128], strides = [1, 1]} : vector<4x288xf32> to vector<4x128xf32>
    %22 = vector.extract_strided_slice %1 {offsets = [0, 136], sizes = [4, 128], strides = [1, 1]} : vector<4x288xf32> to vector<4x128xf32>
    %23 = vector.extract_strided_slice %1 {offsets = [0, 137], sizes = [4, 128], strides = [1, 1]} : vector<4x288xf32> to vector<4x128xf32>
    %24 = vector.extract_strided_slice %1 {offsets = [0, 143], sizes = [4, 128], strides = [1, 1]} : vector<4x288xf32> to vector<4x128xf32>
    %25 = vector.extract_strided_slice %1 {offsets = [0, 144], sizes = [4, 128], strides = [1, 1]} : vector<4x288xf32> to vector<4x128xf32>
    %26 = vector.extract_strided_slice %1 {offsets = [0, 145], sizes = [4, 128], strides = [1, 1]} : vector<4x288xf32> to vector<4x128xf32>
    %27 = vector.extract_strided_slice %1 {offsets = [0, 151], sizes = [4, 128], strides = [1, 1]} : vector<4x288xf32> to vector<4x128xf32>
    %28 = vector.extract_strided_slice %1 {offsets = [0, 152], sizes = [4, 128], strides = [1, 1]} : vector<4x288xf32> to vector<4x128xf32>
    %29 = vector.extract_strided_slice %1 {offsets = [0, 153], sizes = [4, 128], strides = [1, 1]} : vector<4x288xf32> to vector<4x128xf32>
    %cst = arith.constant 0.000000e+00 : f32
    %30 = vector.broadcast %cst : f32 to vector<20x128xf32>
    %31 = tpu.concatenate %3, %4, %5, %6, %7, %8, %9, %10, %11, %12, %13, %14, %15, %16, %17, %18 in 0 : vector<4x128xf32>, vector<4x128xf32>, vector<4x128xf32>, vector<4x128xf32>, vector<4x128xf32>, vector<4x128xf32>, vector<4x128xf32>, vector<4x128xf32>, vector<4x128xf32>, vector<4x128xf32>, vector<4x128xf32>, vector<4x128xf32>, vector<4x128xf32>, vector<4x128xf32>, vector<4x128xf32>, vector<4x128xf32> -> vector<64x128xf32>
    %32 = tpu.concatenate %19, %20, %21, %22, %23, %24, %25, %26, %27, %28, %29, %30 in 0 : vector<4x128xf32>, vector<4x128xf32>, vector<4x128xf32>, vector<4x128xf32>, vector<4x128xf32>, vector<4x128xf32>, vector<4x128xf32>, vector<4x128xf32>, vector<4x128xf32>, vector<4x128xf32>, vector<4x128xf32>, vector<20x128xf32> -> vector<64x128xf32>
    %33 = tpu.concatenate %31, %32 in 0 : vector<64x128xf32>, vector<64x128xf32> -> vector<128x128xf32>
    %34 = arith.mulf %33, %2 : vector<128x128xf32>
    %c0_5 = arith.constant 0 : index
    %c0_6 = arith.constant 0 : index
    %35 = vector.load %arg3[%c0_5, %c0_6] : memref<8x128xf32, #tpu.memory_space<vmem>>, vector<8x128xf32>
    %cst_7 = arith.constant dense<0.000000e+00> : vector<8x128xf32>
    %36 = tpu.matmul %35, %34, %cst_7 {dimension_numbers = #tpu.dot_dimension_numbers<[1], [0], [0], [1], [0, 0, 1, 1], [], []>} : vector<8x128xf32>, vector<128x128xf32>, vector<8x128xf32> -> vector<8x128xf32>
    %cst_8 = arith.constant dense<0.000000e+00> : vector<8xf32>
    %37 = vector.multi_reduction <add>, %36, %cst_8 [1] : vector<8x128xf32> to vector<8xf32>
    %38 = vector.shape_cast %37 : vector<8xf32> to vector<8x1xf32>
    %c0_9 = arith.constant 0 : index
    %c0_10 = arith.constant 0 : index
    %c0_11 = arith.constant 0 : index
    %c0_12 = arith.constant 0 : index
    %39 = vector.load %arg5[%c0_9, %c0_10, %c0_11, %c0_12] : memref<1x1x8x1xf32, #tpu.memory_space<vmem>>, vector<1x1x8x1xf32>
    %40 = vector.shape_cast %39 : vector<1x1x8x1xf32> to vector<8x1xf32>
    %41 = vector.shape_cast %38 : vector<8x1xf32> to vector<1x1x8x1xf32>
    tpu.vector_store %arg5[%c0_9, %c0_10, %c0_11, %c0_12], %41 {strides = array<i32>} : memref<1x1x8x1xf32, #tpu.memory_space<vmem>>, vector<1x1x8x1xf32>,
    %42 = arith.mulf %36, %36 : vector<8x128xf32>
    %cst_13 = arith.constant dense<0.000000e+00> : vector<8xf32>
    %43 = vector.multi_reduction <add>, %42, %cst_13 [1] : vector<8x128xf32> to vector<8xf32>
    %44 = vector.shape_cast %43 : vector<8xf32> to vector<8x1xf32>
    %c0_14 = arith.constant 0 : index
    %c0_15 = arith.constant 0 : index
    %c0_16 = arith.constant 0 : index
    %c0_17 = arith.constant 0 : index
    %45 = vector.load %arg6[%c0_14, %c0_15, %c0_16, %c0_17] : memref<1x1x8x1xf32, #tpu.memory_space<vmem>>, vector<1x1x8x1xf32>
    %46 = vector.shape_cast %45 : vector<1x1x8x1xf32> to vector<8x1xf32>
    %47 = vector.shape_cast %44 : vector<8x1xf32> to vector<1x1x8x1xf32>
    tpu.vector_store %arg6[%c0_14, %c0_15, %c0_16, %c0_17], %47 {strides = array<i32>} : memref<1x1x8x1xf32, #tpu.memory_space<vmem>>, vector<1x1x8x1xf32>,
    return
  }
  func.func @transform_0(%arg0: i32, %arg1: i32) -> (i32, i32, i32, i32) {
    %c0_i32 = arith.constant 0 : i32
    %c0_i32_0 = arith.constant 0 : i32
    %c0_i32_1 = arith.constant 0 : i32
    return %arg0, %arg1, %c0_i32, %c0_i32_0 : i32, i32, i32, i32
  }
  func.func @transform_1(%arg0: i32, %arg1: i32) -> (i32, i32) {
    %c0_i32 = arith.constant 0 : i32
    %c0_i32_0 = arith.constant 0 : i32
    %c0_i32_1 = arith.constant 0 : i32
    return %c0_i32, %c0_i32_0 : i32, i32
  }
  func.func @transform_2(%arg0: i32, %arg1: i32) -> (i32, i32) {
    %c0_i32 = arith.constant 0 : i32
    %c0_i32_0 = arith.constant 0 : i32
    %c0_i32_1 = arith.constant 0 : i32
    return %c0_i32, %c0_i32_0 : i32, i32
  }
  func.func @transform_3(%arg0: i32, %arg1: i32) -> (i32, i32, i32, i32) {
    %c0_i32 = arith.constant 0 : i32
    %c0_i32_0 = arith.constant 0 : i32
    %c0_i32_1 = arith.constant 0 : i32
    return %arg0, %arg1, %c0_i32, %c0_i32_0 : i32, i32, i32, i32
  }
  func.func @transform_4(%arg0: i32, %arg1: i32) -> (i32, i32, i32, i32) {
    %c0_i32 = arith.constant 0 : i32
    %c0_i32_0 = arith.constant 0 : i32
    %c0_i32_1 = arith.constant 0 : i32
    return %arg0, %arg1, %c0_i32, %c0_i32_0 : i32, i32, i32, i32
  }
}

</mosaic_0001>

<bundles_post_ra>
// kernel: tpu_custom_call.1
= control target key start
LH: loop header
LB: loop body
LE: loop exit
PB: predicated region body
PF: predicated region fallthrough
CT: control target
= control target key end

     0   :  { %s1950_s0 = inlined_call_operand.hbm [shape: f32[2,4,4,288], index: 0, kind: input, shape index: {}]   ;;  %s1951_s1 = inlined_call_operand.hbm [shape: f32[8,128], index: 1, kind: input, shape index: {}]   ;;  %s1952_s2 = inlined_call_operand.hbm [shape: f32[128,128], index: 2, kind: input, shape index: {}]   ;;  %s1953_s3 = inlined_call_operand.vmem [shape: f32[2,4,8,1], index: 3, kind: output, shape index: {0}]   ;;  %s1954_s4 = inlined_call_operand.vmem [shape: f32[2,4,8,1], index: 4, kind: output, shape index: {1}]  }
   0x1   :  { %1960 = sst [smem:[#allocation10_spill]] %s1951_s1 }
   0x2   :  { %1961 = sst [smem:[#allocation11_spill]] %s1952_s2 }
   0x3   :  { %10 = vsyncpa [#allocation3], 0 }
   0x4   :  { %12 = vsyncpa [#allocation3 + $0x1], 0 }
   0x5   :  { %13 = vsyncpa [#allocation5], 0  ;;  %s1551_s15 = smov 0   ;;  %s1553_s16 = smov 0  }
   0x6   :  { %s1555_s17 = smov 0   ;;  %s1557_s18 = smov 0  }
   0x7   :  { %s1559_s19 = smov 0   ;;  %s1561_s20 = smov 0  }
   0x8   :  { %s1563_s21 = smov 0   ;;  %s1565_s22 = smov 0  }
   0x9 LB: > { %s1039_s23 = sadd.s32 4294967295, %s1491_s22   ;;  %p53_p0 = scmp.ne.s32.totalorder %s1467_s16, %s1463_s15  ;;  %s1491_s22 = sphi %s1565_s22, %s19_s22   ;;  %s1487_s21 = sphi %s1563_s21, %s1982_s21   ;;  %s1483_s20 = sphi %s1561_s20, %s1981_s20   ;;  %s1479_s19 = sphi %s1559_s19, %s1980_s19   ;;  %s1475_s18 = sphi %s1557_s18, %s1979_s18   ;;  %s1471_s17 = sphi %s1555_s17, %s1978_s17   ;;  %s1467_s16 = sphi %s1553_s16, %s1977_s16   ;;  %s1463_s15 = sphi %s1551_s15, %s1976_s15  }
   0xa   : > { %p1591_p1 = scmp.eq.s32.totalorder %s1039_s23, 0  ;;  %p1041_p2 = scmp.ge.s32.totalorder %s1491_s22, 1 }
   0xb   : > { %p162_p3 = scmp.lt.s32.totalorder %s1491_s22, 9  ;;  %s1493_s27 = smov [#allocation4]  }
   0xc   : > { %s1962_s24 = scalar_select %p1591_p1, 1, 0 }
   0xd   : > { %p1599_p4 = por %p1591_p1, %p53_p0  ;;  %p1603_p5 = pnand %p1041_p2, %p162_p3 }
   0xe   : > { %s175_s28 = sshll.u32 %s1493_s27, 4  ;;  %s1494_s29 = smov [#allocation6]   ;;  %s176_s28 = int_to_ptr.vmem [resolvable:$true] %s175_s28 }
   0xf   : > { %s1963_s25 = scalar_select %p1599_p4, 1, 0 }
  0x10   : > { %s1964_s26 = scalar_select %p1603_p5, 1, 0 }
  0x11   : > { %p1145_p6 = pneg %p1603_p5  ;;  %s185_s30 = sshll.u32 %s1494_s29, 4  ;;  %s1615_s30 = int_to_ptr.vmem [resolvable:$true] %s185_s30 }
  0x12   : > { %s1966_s1 = sld [smem:[#allocation10_spill]] }
  0x13   : > { %p1611_p7 = pnand %p1145_p6, %p1591_p1 }
  0x15   : > { %p1337_p9 = pneg %p1611_p7 }
  0x18   : > { %s1335_s8 = scalar_lea.hbm %s1966_s1, 128 }
  0x19   : > { %p1336_p8 = scmp.ne.s32.totalorder %s1966_s1, %s1335_s8  ;;  %p1342_p12 = scmp.lt.u32.totalorder %s1335_s8, %s1966_s1 }
  0x1b   : > { %p1338_p10 = pnand %p1337_p9, %p1336_p8 }
  0x1d   : > { %p1339_p11 = pneg %p1338_p10 }
  0x1f   : > { %p1344_p13 = pnand %p1342_p12, %p1339_p11 }
  0x21   : > { %1347 = shalt.err (!%p1344_p13)
}
  0x22   : > { %s1348_s13 = scalar_lea.vmem %s176_s28, 128  ;;  %p1356_p6 = scmp.lt.s32.totalorder %s176_s28, %s176_s28 }
  0x23   : > { %p1349_p0 = scmp.ne.s32.totalorder %s176_s28, %s1348_s13  ;;  %p1357_p1 = scmp.lt.s32.totalorder %s1348_s13, %s1348_s13 }
  0x25   : > { %p1351_p2 = pnand %p1349_p0, %p1337_p9  ;;  %p1358_p4 = por %p1357_p1, %p1356_p6 }
  0x27   : > { %p1352_p3 = pneg %p1351_p2 }
  0x29   : > { %p1359_p5 = pnand %p1358_p4, %p1352_p3 }
  0x2b   : > { %1362 = shalt.err (!%p1359_p5)
}
  0x2c   : > { %1148 = dma.hbm_to_vmem [thread:$0]  (!%p1611_p7), %s1966_s1, 128, %s176_s28, [#allocation5]  }
  0x2d   : > { %s1967_s2 = sld [smem:[#allocation11_spill]] }
  0x33   : > { %s1363_s29 = scalar_lea.hbm %s1967_s2, 2048 }
  0x34   : > { %p1364_p8 = scmp.ne.s32.totalorder %s1967_s2, %s1363_s29  ;;  %p1370_p5 = scmp.lt.u32.totalorder %s1363_s29, %s1967_s2 }
  0x36   : > { %p1366_p1 = pnand %p1364_p8, %p1337_p9 }
  0x38   : > { %p1367_p4 = pneg %p1366_p1 }
  0x3a   : > { %p1372_p10 = pnand %p1370_p5, %p1367_p4 }
  0x3c   : > { %1375 = shalt.err (!%p1372_p10)
}
  0x3d   : > { %s1376_s28 = scalar_lea.vmem %s1615_s30, 2048  ;;  %p1384_p0 = scmp.lt.s32.totalorder %s1615_s30, %s1615_s30 }
  0x3e   : > { %p1377_p11 = scmp.ne.s32.totalorder %s1615_s30, %s1376_s28  ;;  %p1385_p2 = scmp.lt.s32.totalorder %s1376_s28, %s1376_s28 }
  0x40   : > { %p1379_p12 = pnand %p1377_p11, %p1337_p9  ;;  %p1386_p3 = por %p1385_p2, %p1384_p0 }
  0x42   : > { %p1380_p13 = pneg %p1379_p12 }
  0x44   : > { %p1387_p6 = pnand %p1386_p3, %p1380_p13 }
  0x46   : > { %1390 = shalt.err (!%p1387_p6)
}
  0x47   : > { %s1495_s10 = smov 128   ;;  %s1496_s11 = smov 8  }
  0x48   : > { %1151 = dma.hbm_to_vmem [thread:$0]  (!%p1611_p7), %s1967_s2, 2048, %s1615_s30, [#allocation5], %s1495_s10, %s1495_s10, %s1496_s11  }
  0x49   : > { %s28_s14 = sadd.s32 1, %s1483_s20  ;;  %s31_s15 = sadd.s32 1, %s1487_s21 }
  0x4a   : > { %p29_p9 = scmp.ge.s32.totalorder %s28_s14, 4  ;;  %p47_p8 = scmp.ne.s32.totalorder %s1471_s17, %s1467_s16 }
  0x4b   : > { %p48_p1 = scmp.eq.s32.totalorder %s1491_s22, 0  ;;  %s40_s27 = sadd.s32 1, %s1471_s17 }
  0x4c   : > { %s1984_s14 = smov (%p29_p9, %s28_s14), 0  ;;  %s1986_s15 = smov (!%p29_p9, %s31_s15), %s1487_s21 }
  0x4d   : > { %1968 = sst [smem:[#allocation9_spill]] %s1984_s14  ;;  %s36_s23 = ssub.s32 %s1483_s20, %s1984_s14 }
  0x4e   : > { %p33_p4 = scmp.ge.s32.totalorder %s1986_s15, 2  ;;  %p1675_p5 = por %p48_p1, %p47_p8 }
  0x4f   : > { %s199_s30 = sand.u32 1, %s1471_s17   ;;  %s1132_s29 = smul.u32 3, %s1483_s20 }
  0x50   : > { %s1988_s15 = smov (%p33_p4, %s1986_s15), 0  ;;  %p1158_p7 = scmp.lt.s32.totalorder %s1491_s22, 8 }
  0x51   : > { %s1131_s6 = smul.u32 12, %s199_s30  ;;  %s35_s7 = ssub.s32 %s1487_s21, %s1988_s15 }
  0x52   : > { %s1133_s8 = smul.u32 12, %s1487_s21  ;;  %s37_s9 = sor.u32 %s36_s23, %s35_s7 }
  0x53   : > { %p38_p10 = scmp.eq.s32.totalorder %s37_s9, 0  ;;  %s203_s11 = scalar_lea.vmem [#allocation2], %s1131_s6 }
  0x54   : > { %s209_s28 = sadd.s32 %s1133_s8, %s1132_s29  ;;  %s213_s12 = sshll.u32 %s203_s11, 4  ;;  %s1695_s12 = int_to_ptr.vmem [resolvable:$true] %s213_s12 }
  0x55   : > { %s1045_s10 = sshll.u32 %s209_s28, 6  ;;  %p1701_p11 = pnand %p1158_p7, %p1675_p5 }
  0x56   : > { %s1688_s13 = scalar_select %p38_p10, %s1471_s17, %s40_s27  }
  0x57   : > { %s1693_s14 = scalar_lea.hbm %s1950_s0, %s1045_s10  ;;  %s200_s27 = scalar_lea.sflag [#allocation3], %s199_s30 }
  0x58   : > { %s1391_s29 = scalar_lea.hbm %s1693_s14, 192  ;;  %p1393_p13 = pneg %p1701_p11 }
  0x59   : > { %p1392_p12 = scmp.ne.s32.totalorder %s1693_s14, %s1391_s29  ;;  %s1396_s5 = scalar_lea.hbm %s1950_s0, 1536 }
  0x5a   : > { %p1397_p3 = scmp.lt.u32.totalorder %s1693_s14, %s1950_s0  ;;  %p1398_p6 = scmp.lt.u32.totalorder %s1396_s5, %s1391_s29 }
  0x5b   : > { %p1394_p0 = pnand %p1393_p13, %p1392_p12  ;;  %p1400_p8 = scmp.lt.u32.totalorder %s1391_s29, %s1693_s14 }
  0x5c   : > { %p1399_p9 = por %p1398_p6, %p1397_p3 }
  0x5d   : > { %p1395_p2 = pneg %p1394_p0 }
  0x5e   : > { %p1401_p1 = por %p1400_p8, %p1399_p9 }
  0x60   : > { %p1402_p4 = pnand %p1401_p1, %p1395_p2 }
  0x62   : > { %1405 = shalt.err (!%p1402_p4)
}
  0x63   : > { %s1406_s30 = scalar_lea.vmem %s1695_s12, 192  ;;  %s1497_s8 = smov [#allocation2]  }
  0x64   : > { %p1407_p5 = scmp.ne.s32.totalorder %s1695_s12, %s1406_s30  ;;  %s1411_s9 = sshll.u32 %s1497_s8, 4  ;;  %s1412_s9 = int_to_ptr.vmem [resolvable:$false] %s1411_s9 }
  0x65   : > { %s1413_s28 = scalar_lea.vmem %s1412_s9, 384  ;;  %p1414_p12 = scmp.lt.s32.totalorder %s1695_s12, %s1412_s9 }
  0x66   : > { %p1409_p7 = pnand %p1407_p5, %p1393_p13  ;;  %p1415_p0 = scmp.lt.s32.totalorder %s1413_s28, %s1406_s30 }
  0x68   : > { %p1410_p10 = pneg %p1409_p7  ;;  %p1416_p3 = por %p1415_p0, %p1414_p12 }
  0x6a   : > { %p1417_p6 = pnand %p1416_p3, %p1410_p10 }
  0x6c   : > { %1420 = shalt.err (!%p1417_p6)
}
  0x6d   : > { %1155 = dma.hbm_to_vmem [thread:$0]  (!%p1701_p11), %s1693_s14, 192, %s1695_s12, %s200_s27  }
  0x6e   : > { %p1971_p2 = scmp.ne.s32.totalorder %s1964_s26, 0 }
  0x6f   : > { %s224_s10 = sand.u32 (!%p1971_p2), 1, %s1467_s16   ;;  %p1972_p13 = scmp.ne.s32.totalorder (!%p1971_p2), %s1963_s25, 0 }
  0x70   : > { %222 = sbr.rel (%p1971_p2) target bundleno = 891 (0x37b), region = 32  ;;  %s225_s29 = scalar_lea.sflag (!%p1971_p2), [#allocation3], %s224_s10 }
  0x71   : > { %s1134_s11 = smul.u32 (!%p1971_p2), 12, %s224_s10 }
  0x73   : > { %s228_s1 = scalar_lea.vmem (!%p1971_p2), [#allocation2], %s1134_s11 }
  0x77   : > { %1454 = dma.done.wait (%p1972_p13), %s225_s29, 192  }
  0x78   : > { %1456 = vsyncadd (%p1972_p13), %s225_s29, 4294967104  ;;  %p1973_p9 = scmp.ne.s32.totalorder %s1962_s24, 0 }
  0x7a   : > { %1458 = dma.done.wait (%p1973_p9), [#allocation5], 2176  }
  0x7b   : > { %1460 = vsyncadd (%p1973_p9), [#allocation5], 4294965120  ;;  %v289_v0 = vld [vmem:[%s228_s1 + $0x8] sm:$0xf]  ;;  %v1741_v1 = vld [vmem:[%s228_s1] sm:$0xff]  ;;  %s1498_s26 = smov 81  }
  0x7c   : > { %450 = vrot.lane.b32.xlu1 %v289_v0, %s1498_s26  ;;  %s1499_s14 = smov 127   ;;  %v1746_v2 = vcombine.high %v1741_v1, %v1741_v1  ;;  %s1500_s25 = smov 80   ;;  %v1752_v3 = vcombine.low %v1741_v1, %v1741_v1  ;;  %v456_v4 = vcombine.low %v289_v0, %v289_v0  ;;  %v290_v5 = vld [vmem:[#allocation6] sm:$0xff]  ;;  %v291_v6 = vld [vmem:[#allocation6 + $0x8] sm:$0xff]  ;;  %v292_v7 = vld [vmem:[#allocation6 + $0x10] sm:$0xff]  ;;  %vm430_vm0 = vcmask 1043456  }
  0x7d   : > { %312 = vrot.lane.b32.xlu0 %v1741_v1, %s1499_s14  ;;  %s1501_s24 = smov 79   ;;  %s1502_s12 = smov 73   ;;  %v293_v8 = vld [vmem:[#allocation6 + $0x18] sm:$0xff]  ;;  %v294_v9 = vld [vmem:[#allocation6 + $0x20] sm:$0xff]  ;;  %v295_v10 = vld [vmem:[#allocation6 + $0x28] sm:$0xff]  ;;  %vm452_vm1 = vcmask 662528  }
  0x7e   : > { %s1503_s23 = smov 72   ;;  %s1504_s27 = smov 71   ;;  %v297_v11 = vld [vmem:[#allocation6 + $0x38] sm:$0xff]  ;;  %v296_v12 = vld [vmem:[#allocation6 + $0x30] sm:$0xff]  ;;  %v299_v13 = vld [vmem:[#allocation6 + $0x48] sm:$0xff]  ;;  %vm461_vm2 = vcmask 654336  }
  0x7f   : > { %s1505_s2 = smov 64   ;;  %s1506_s5 = smov 63   ;;  %v298_v14 = vld [vmem:[#allocation6 + $0x40] sm:$0xff]  ;;  %vm469_vm3 = vcmask 646144   ;;  %vm477_vm4 = vcmask 596992   ;;  %vm485_vm5 = vcmask 588800  }
  0x80   : > { %448 = vrot.lane.b32.xlu1 %v1746_v2, %s1498_s26  ;;  %s1507_s6 = smov 65   ;;  %s1508_s7 = smov 126   ;;  %vm493_vm6 = vcmask 580608   ;;  %vm314_vm7 = vcmask 1039360   ;;  %v301_v45 = vld [vmem:[#allocation6 + $0x58] sm:$0xff]  ;;  %v300_v47 = vld [vmem:[#allocation6 + $0x50] sm:$0xff] }
  0x81   : > { %457 = vrot.lane.b32.xlu0 %v1741_v1, %s1500_s25  ;;  %s1509_s30 = smov 120   ;;  %s1510_s8 = smov 7   ;;  %vm501_vm8 = vcmask 531456   ;;  %vm378_vm9 = vcmask 523264   ;;  %vm386_vm10 = vcmask 515072   ;;  %vm322_vm11 = vcmask 1031168  }
  0x82   : > { %s1511_s9 = smov 119   ;;  %s1512_s28 = smov 118   ;;  %vm330_vm12 = vcmask 982016   ;;  %v302_v61 = vld [vmem:[#allocation6 + $0x60] sm:$0xff]  ;;  %vm338_vm13 = vcmask 973824   ;;  %vm346_vm14 = vcmask 965632  }
  0x83   : > { %s1513_s10 = smov 112   ;;  %s1514_s11 = smov 111   ;;  %vm354_vm15 = vcmask 916480  }
  0x84   : > { %459 = vrot.lane.b32.xlu1 %v456_v4, %s1500_s25  ;;  %s1515_s29 = smov 110   ;;  %s1516_s1 = smov 62  }
  0x85   : > { %310 = vrot.lane.b32.xlu0 %v1752_v3, %s1499_s14  ;;  %s1517_s26 = smov 56   ;;  %s1518_s14 = smov 55  }
  0x86   : > { %s1519_s25 = smov 54   ;;  %p272_p11 = scmp.lt.s32.totalorder %s1479_s19, 1 }
  0x87   : > { %p274_p8 = scmp.lt.s32.totalorder %s1475_s18, 3 }
  0x88   : > { %467 = vrot.lane.b32.xlu1 %v289_v0, %s1501_s24  ;;  %s1990_s19 = smov (!%p272_p11, %s1479_s19), 1 }
  0x89   : > { %465 = vrot.lane.b32.xlu0 %v1746_v2, %s1501_s24  ;;  %s1520_s24 = smov 48   ;;  %s1992_s18 = smov (!%p274_p8, %s1475_s18), 3 }
  0x8c   : > { %475 = vrot.lane.b32.xlu1 %v456_v4, %s1502_s12 }
  0x8d   : > { %473 = vrot.lane.b32.xlu0 %v1741_v1, %s1502_s12  ;;  %s1521_s12 = smov 47  }
  0x90   : > { %483 = vrot.lane.b32.xlu1 %v289_v0, %s1503_s23 }
  0x91   : > { %481 = vrot.lane.b32.xlu0 %v1746_v2, %s1503_s23  ;;  %s1524_s23 = smov 121  }
  0x94   : > { %491 = vrot.lane.b32.xlu1 %v456_v4, %s1504_s27 }
  0x95   : > { %489 = vrot.lane.b32.xlu0 %v1741_v1, %s1504_s27  ;;  %s1049_s27 = sshll.u32 %s1990_s19, 2 }
  0x98   : > { %384 = vrot.lane.b32.xlu1 %v1746_v2, %s1506_s5 }
  0x99   : > { %376 = vrot.lane.b32.xlu0 %v1741_v1, %s1505_s2 }
  0x9c   : > { %499 = vrot.lane.b32.xlu1 %v289_v0, %s1507_s6 }
  0x9d   : > { %497 = vrot.lane.b32.xlu0 %v1746_v2, %s1507_s6 }
  0xa0   : > { %509 = vrot.lane.b32.xlu1 %v289_v0, %s1506_s5 }
  0xa1   : > { %505 = vrot.lane.b32.xlu0 %v456_v4, %s1505_s2 }
  0xa4   : > { %320 = vrot.lane.b32.xlu1 %v1746_v2, %s1508_s7 }
  0xa5   : > { %318 = vrot.lane.b32.xlu0 %v1741_v1, %s1508_s7 }
  0xa8   : > { %328 = vrot.lane.b32.xlu1 %v1741_v1, %s1509_s30 }
  0xa9   : > { %326 = vrot.lane.b32.xlu0 %v1752_v3, %s1509_s30 }
  0xac   : > { %600 = vrot.lane.b32.xlu1 %v291_v6, %s1510_s8 }
  0xad   : > { %598 = vrot.lane.b32.xlu0 %v290_v5, %s1510_s8 }
  0xb0   : > { %336 = vrot.lane.b32.xlu1 %v1746_v2, %s1511_s9 }
  0xb1   : > { %334 = vrot.lane.b32.xlu0 %v1741_v1, %s1511_s9 }
  0xb4   : > { %344 = vrot.lane.b32.xlu1 %v1741_v1, %s1512_s28 }
  0xb5   : > { %342 = vrot.lane.b32.xlu0 %v1752_v3, %s1512_s28 }
  0xb8   : > { %352 = vrot.lane.b32.xlu1 %v1746_v2, %s1513_s10 }
  0xb9   : > { %350 = vrot.lane.b32.xlu0 %v1741_v1, %s1513_s10 }
  0xbc   : > { %360 = vrot.lane.b32.xlu1 %v1741_v1, %s1514_s11 }
  0xbd   : > { %358 = vrot.lane.b32.xlu0 %v1752_v3, %s1514_s11 }
  0xc0   : > { %604 = vrot.lane.b32.xlu1 %v293_v8, %s1510_s8  ;;  %v304_v8 = vld [vmem:[#allocation6 + $0x70] sm:$0xff] }
  0xc1   : > { %602 = vrot.lane.b32.xlu0 %v292_v7, %s1510_s8 }
  0xc4   : > { %368 = vrot.lane.b32.xlu1 %v1746_v2, %s1515_s29 }
  0xc5   : > { %366 = vrot.lane.b32.xlu0 %v1741_v1, %s1515_s29 }
  0xc8   : > { %382 = vrot.lane.b32.xlu1 %v1741_v1, %s1506_s5 }
  0xc9   : > { %374 = vrot.lane.b32.xlu0 %v1752_v3, %s1505_s2  ;;  %s277_s2 = sadd.s32 %s1049_s27, %s1992_s18 }
  0xca   : > { %s1050_s5 = sshll.u32 %s277_s2, 3 }
  0xcb   : > { %s279_s30 = scalar_lea.vmem %s1953_s3, %s1050_s5  ;;  %s287_s28 = scalar_lea.vmem %s1954_s4, %s1050_s5 }
  0xcc   : > { %392 = vrot.lane.b32.xlu1 %v1741_v1, %s1516_s1 }
  0xcd   : > { %390 = vrot.lane.b32.xlu0 %v1752_v3, %s1516_s1 }
  0xd0   : > { %608 = vrot.lane.b32.xlu1 %v295_v10, %s1510_s8 }
  0xd1   : > { %606 = vrot.lane.b32.xlu0 %v294_v9, %s1510_s8 }
  0xd4   : > { %400 = vrot.lane.b32.xlu1 %v1746_v2, %s1517_s26 }
  0xd5   : > { %398 = vrot.lane.b32.xlu0 %v1741_v1, %s1517_s26 }
  0xd8   : > { %408 = vrot.lane.b32.xlu1 %v1741_v1, %s1518_s14 }
  0xd9   : > { %406 = vrot.lane.b32.xlu0 %v1752_v3, %s1518_s14 }
  0xdc   : > { %416 = vrot.lane.b32.xlu1 %v1746_v2, %s1519_s25 }
  0xdd   : > { %414 = vrot.lane.b32.xlu0 %v1741_v1, %s1519_s25 }
  0xe0   : > { %424 = vrot.lane.b32.xlu1 %v1741_v1, %s1520_s24 }
  0xe1   : > { %422 = vrot.lane.b32.xlu0 %v1752_v3, %s1520_s24  ;;  %v1522_v3 = vmov 0.0|0.0  }
  0xe2   : > { %1107 = vmatprep.subr.bf16.mxu0 %v1522_v3 }
  0xe4   : > { %612 = vrot.lane.b32.xlu1 %v297_v11, %s1510_s8 }
  0xe5   : > { %610 = vrot.lane.b32.xlu0 %v296_v12, %s1510_s8 }
  0xe8   : > { %616 = vrot.lane.b32.xlu1 %v299_v13, %s1510_s8  ;;  %v1523_v13 = vmov 0.0  }
  0xe9   : > { %614 = vrot.lane.b32.xlu0 %v298_v14, %s1510_s8  ;;  %v305_v14 = vld [vmem:[#allocation6 + $0x78] sm:$0xff] }
  0xee   : > { %v451_v15 = vpop.permute.xlu1 %450 }
  0xef   : > { %v313_v16 = vpop.permute.xlu0 %312 }
  0xf0   : > { %v1806_v17 = vsel %vm430_vm0, %v1746_v2, %v313_v16 }
  0xf1   : > { %538 = vrot.lane.b32.xlu1 %v1806_v17, %s1521_s12 }
  0xf2   : > { %v449_v19 = vpop.permute.xlu1 %448 }
  0xf3   : > { %v458_v18 = vpop.permute.xlu0 %457  ;;  %v453_v23 = vsel %vm452_vm1, %v449_v19, %v451_v15  ;;  %vm362_vm1 = vcmask 908288  }
  0xf4   : > { %v513_v20 = vsel %vm430_vm0, %v449_v19, %v458_v18 }
  0xf5   : > { %540 = vrot.lane.b32.xlu0 %v513_v20, %s1521_s12 }
  0xf6   : > { %v460_v22 = vpop.permute.xlu1 %459 }
  0xf7   : > { %v311_v21 = vpop.permute.xlu0 %310  ;;  %v462_v24 = vsel %vm461_vm2, %v458_v18, %v460_v22  ;;  %vm370_vm2 = vcmask 900096  }
  0xf8   : > { %v514_v25 = vsel %vm430_vm0, %v453_v23, %v462_v24  ;;  %v315_v41 = vsel %vm314_vm7, %v311_v21, %v313_v16  ;;  %vm426_vm7 = vcmask 392192  }
  0xf9   : > { %542 = vrot.lane.b32.xlu1 %v514_v25, %s1521_s12  ;;  %v431_v46 = vsel %vm430_vm0, %v1741_v1, %v315_v41  ;;  %v303_v1 = vld [vmem:[#allocation6 + $0x68] sm:$0xff] }
  0xfa   : > { %v468_v27 = vpop.permute.xlu1 %467 }
  0xfb   : > { %v466_v26 = vpop.permute.xlu0 %465 }
  0xfc   : > { %v470_v30 = vsel %vm469_vm3, %v466_v26, %v468_v27  ;;  %vm394_vm3 = vcmask 506880  }
  0xfe   : > { %v476_v29 = vpop.permute.xlu1 %475 }
  0xff   : > { %v474_v28 = vpop.permute.xlu0 %473 }
 0x100   : > { %v478_v31 = vsel %vm477_vm4, %v474_v28, %v476_v29  ;;  %v515_v32 = vsel %vm430_vm0, %v466_v26, %v474_v28  ;;  %vm402_vm4 = vcmask 457728  }
 0x101   : > { %544 = vrot.lane.b32.xlu0 %v515_v32, %s1521_s12  ;;  %v516_v33 = vsel %vm430_vm0, %v470_v30, %v478_v31 }
 0x102   : > { %546 = vrot.lane.b32.xlu1 %v516_v33, %s1521_s12  ;;  %v484_v35 = vpop.permute.xlu1 %483 }
 0x103   : > { %v482_v34 = vpop.permute.xlu0 %481 }
 0x104   : > { %v486_v38 = vsel %vm485_vm5, %v482_v34, %v484_v35  ;;  %vm410_vm5 = vcmask 449536  }
 0x106   : > { %v492_v37 = vpop.permute.xlu1 %491 }
 0x107   : > { %v490_v36 = vpop.permute.xlu0 %489 }
 0x108   : > { %v494_v39 = vsel %vm493_vm6, %v490_v36, %v492_v37  ;;  %v517_v40 = vsel %vm430_vm0, %v482_v34, %v490_v36  ;;  %vm418_vm6 = vcmask 441344  }
 0x109   : > { %548 = vrot.lane.b32.xlu0 %v517_v40, %s1521_s12  ;;  %v518_v42 = vsel %vm430_vm0, %v486_v38, %v494_v39 }
 0x10a   : > { %550 = vrot.lane.b32.xlu1 %v518_v42, %s1521_s12  ;;  %v1824_v44 = vpop.permute.xlu1 %384 }
 0x10b   : > { %v1822_v43 = vpop.permute.xlu0 %376  ;;  %v521_v59 = vsel %vm430_vm0, %v1824_v44, 0.0 }
 0x10d   : > { %536 = vrot.lane.b32.xlu0 %v431_v46, %s1521_s12 }
 0x10e   : > { %620 = vrot.lane.b32.xlu1 %v301_v45, %s1510_s8  ;;  %v500_v49 = vpop.permute.xlu1 %499 }
 0x10f   : > { %v498_v48 = vpop.permute.xlu0 %497 }
 0x110   : > { %v502_v52 = vsel %vm501_vm8, %v498_v48, %v500_v49  ;;  %v519_v54 = vsel %vm430_vm0, %v498_v48, %v1822_v43  ;;  %vm562_vm8 = vcmask 384000  }
 0x111   : > { %618 = vrot.lane.b32.xlu0 %v300_v47, %s1510_s8 }
 0x112   : > { %v510_v51 = vpop.permute.xlu1 %509 }
 0x113   : > { %v506_v50 = vpop.permute.xlu0 %505  ;;  %v511_v56 = vsel %vm386_vm10, %v1824_v44, %v510_v51 }
 0x114   : > { %v507_v53 = vsel %vm378_vm9, %v1822_v43, %v506_v50  ;;  %v522_v60 = vsel %vm430_vm0, %v511_v56, 0.0 }
 0x115   : > { %552 = vrot.lane.b32.xlu0 %v519_v54, %s1521_s12  ;;  %v520_v55 = vsel %vm430_vm0, %v502_v52, %v507_v53 }
 0x116   : > { %554 = vrot.lane.b32.xlu1 %v520_v55, %s1521_s12  ;;  %v321_v58 = vpop.permute.xlu1 %320 }
 0x117   : > { %v319_v57 = vpop.permute.xlu0 %318 }
 0x118   : > { %v323_v62 = vsel %vm322_vm11, %v319_v57, %v321_v58 }
 0x119   : > { %556 = vrot.lane.b32.xlu0 %v521_v59, %s1521_s12 }
 0x11a   : > { %558 = vrot.lane.b32.xlu1 %v522_v60, %s1521_s12  ;;  %v329_v0 = vpop.permute.xlu1 %328 }
 0x11b   : > { %v327_v63 = vpop.permute.xlu0 %326  ;;  %v434_v4 = vsel %vm430_vm0, %v321_v58, %v329_v0 }
 0x11c   : > { %v331_v2 = vsel %vm330_vm12, %v327_v63, %v329_v0 }
 0x11d   : > { %622 = vrot.lane.b32.xlu0 %v302_v61, %s1510_s8  ;;  %v433_v5 = vsel %vm430_vm0, %v323_v62, %v331_v2 }
 0x11e   : > { %624 = vrot.lane.b32.xlu1 %v303_v1, %s1510_s8  ;;  %v601_v7 = vpop.permute.xlu1 %600 }
 0x11f   : > { %v599_v6 = vpop.permute.xlu0 %598  ;;  %v648_v11 = vmul.f32 %v601_v7, %v433_v5  ;;  %v649_v12 = vmul.f32 %v601_v7, %v434_v4 }
 0x120   : > { %v646_v9 = vmul.f32 %v599_v6, %v431_v46  ;;  %v647_v10 = vmul.f32 %v599_v6, %v1806_v17 }
 0x121   : > { %560 = vrot.lane.b32.xlu0 %v1523_v13, %s1521_s12  ;;  %v1262_v19 = vpack.i.bf16 %v649_v12, %v648_v11 }
 0x122   : > { %626 = vrot.lane.b32.xlu1 %v304_v8, %s1510_s8  ;;  %v337_v16 = vpop.permute.xlu1 %336  ;;  %v1257_v18 = vpack.i.bf16 %v647_v10, %v646_v9 }
 0x123   : > { %v335_v15 = vpop.permute.xlu0 %334 }
 0x124   : > { %v339_v23 = vsel %vm338_vm13, %v335_v15, %v337_v16 }
 0x125   : > { %628 = vrot.lane.b32.xlu0 %v305_v14, %s1510_s8 }
 0x126   : > { %1258 = vrot.lane.b32.xlu1 %v1257_v18, %s1524_s23  ;;  %v345_v17 = vpop.permute.xlu1 %344 }
 0x127   : > { %v343_v20 = vpop.permute.xlu0 %342  ;;  %v436_v29 = vsel %vm430_vm0, %v337_v16, %v345_v17 }
 0x128   : > { %v347_v24 = vsel %vm346_vm14, %v343_v20, %v345_v17 }
 0x129   : > { %1263 = vrot.lane.b32.xlu0 %v1262_v19, %s1524_s23  ;;  %v435_v31 = vsel %vm430_vm0, %v339_v23, %v347_v24 }
 0x12a   : > { %v353_v22 = vpop.permute.xlu1 %352 }
 0x12b   : > { %v351_v21 = vpop.permute.xlu0 %350 }
 0x12c   : > { %v355_v25 = vsel %vm354_vm15, %v351_v21, %v353_v22 }
 0x12e   : > { %v361_v27 = vpop.permute.xlu1 %360 }
 0x12f   : > { %v359_v26 = vpop.permute.xlu0 %358  ;;  %v438_v30 = vsel %vm430_vm0, %v353_v22, %v361_v27 }
 0x130   : > { %v363_v28 = vsel %vm362_vm1, %v359_v26, %v361_v27 }
 0x131   : > { %v437_v32 = vsel %vm430_vm0, %v355_v25, %v363_v28 }
 0x132   : > { %v605_v34 = vpop.permute.xlu1 %604 }
 0x133   : > { %v603_v33 = vpop.permute.xlu0 %602  ;;  %v652_v37 = vmul.f32 %v605_v34, %v437_v32  ;;  %v653_v38 = vmul.f32 %v605_v34, %v438_v30 }
 0x134   : > { %v650_v35 = vmul.f32 %v603_v33, %v435_v31  ;;  %v651_v36 = vmul.f32 %v603_v33, %v436_v29 }
 0x135   : > { %v1272_v40 = vpack.i.bf16 %v653_v38, %v652_v37 }
 0x136   : > { %v1267_v39 = vpack.i.bf16 %v651_v36, %v650_v35  ;;  %v369_v42 = vpop.permute.xlu1 %368 }
 0x137   : > { %v367_v41 = vpop.permute.xlu0 %366  ;;  %1273 = vrot.lane.b32.xlu0 %v1272_v40, %s1524_s23  ;;  %v440_v53 = vsel %vm430_vm0, %v369_v42, %v1822_v43 }
 0x138   : > { %1268 = vrot.lane.b32.xlu1 %v1267_v39, %s1524_s23  ;;  %v371_v49 = vsel %vm370_vm2, %v367_v41, %v369_v42 }
 0x13a   : > { %v383_v46 = vpop.permute.xlu1 %382 }
 0x13b   : > { %v375_v45 = vpop.permute.xlu0 %374  ;;  %v387_v52 = vsel %vm386_vm10, %v383_v46, %v1824_v44  ;;  %vm872_vm10 = vcmask 7168  }
 0x13c   : > { %v379_v50 = vsel %vm378_vm9, %v375_v45, %v1822_v43  ;;  %vm767_vm9 = vcmask 990208  }
 0x13d   : > { %v439_v56 = vsel %vm430_vm0, %v371_v49, %v379_v50 }
 0x13e   : > { %v393_v48 = vpop.permute.xlu1 %392 }
 0x13f   : > { %v391_v47 = vpop.permute.xlu0 %390  ;;  %v442_v54 = vsel %vm430_vm0, %v1824_v44, %v393_v48 }
 0x140   : > { %v395_v51 = vsel %vm394_vm3, %v391_v47, %v393_v48 }
 0x141   : > { %v441_v57 = vsel %vm430_vm0, %v387_v52, %v395_v51 }
 0x142   : > { %v609_v58 = vpop.permute.xlu1 %608 }
 0x143   : > { %v607_v55 = vpop.permute.xlu0 %606  ;;  %v656_v61 = vmul.f32 %v609_v58, %v441_v57  ;;  %v657_v62 = vmul.f32 %v609_v58, %v442_v54 }
 0x144   : > { %v654_v59 = vmul.f32 %v607_v55, %v439_v56  ;;  %v655_v60 = vmul.f32 %v607_v55, %v440_v53 }
 0x145   : > { %v1282_v0 = vpack.i.bf16 %v657_v62, %v656_v61 }
 0x146   : > { %v1277_v63 = vpack.i.bf16 %v655_v60, %v654_v59  ;;  %v401_v1 = vpop.permute.xlu1 %400 }
 0x147   : > { %v399_v2 = vpop.permute.xlu0 %398  ;;  %1283 = vrot.lane.b32.xlu0 %v1282_v0, %s1524_s23 }
 0x148   : > { %1278 = vrot.lane.b32.xlu1 %v1277_v63, %s1524_s23  ;;  %v403_v6 = vsel %vm402_vm4, %v399_v2, %v401_v1 }
 0x14a   : > { %v409_v43 = vpop.permute.xlu1 %408 }
 0x14b   : > { %v407_v44 = vpop.permute.xlu0 %406  ;;  %v444_v12 = vsel %vm430_vm0, %v401_v1, %v409_v43 }
 0x14c   : > { %v411_v7 = vsel %vm410_vm5, %v407_v44, %v409_v43 }
 0x14d   : > { %v443_v16 = vsel %vm430_vm0, %v403_v6, %v411_v7 }
 0x14e   : > { %v417_v4 = vpop.permute.xlu1 %416 }
 0x14f   : > { %v415_v5 = vpop.permute.xlu0 %414 }
 0x150   : > { %v419_v8 = vsel %vm418_vm6, %v415_v5, %v417_v4 }
 0x152   : > { %v425_v9 = vpop.permute.xlu1 %424 }
 0x153   : > { %v423_v10 = vpop.permute.xlu0 %422  ;;  %v446_v14 = vsel %vm430_vm0, %v417_v4, %v425_v9 }
 0x154   : > { %v427_v11 = vsel %vm426_vm7, %v423_v10, %v425_v9 }
 0x155   : > { %v445_v15 = vsel %vm430_vm0, %v419_v8, %v427_v11  ;;  %vm1525_vm0 = vmmov 0  }
 0x156   : > { %v613_v18 = vpop.permute.xlu1 %612  ;;  %1104 = vmatprep.mubr.msk.f32.mxu0 %vm1525_vm0, %v1523_v13 }
 0x157   : > { %v611_v19 = vpop.permute.xlu0 %610  ;;  %v660_v20 = vmul.f32 %v613_v18, %v445_v15  ;;  %v661_v17 = vmul.f32 %v613_v18, %v446_v14 }
 0x158   : > { %v658_v21 = vmul.f32 %v611_v19, %v443_v16  ;;  %v659_v22 = vmul.f32 %v611_v19, %v444_v12 }
 0x159   : > { %v1292_v23 = vpack.i.bf16 %v661_v17, %v660_v20 }
 0x15a   : > { %v1287_v24 = vpack.i.bf16 %v659_v22, %v658_v21  ;;  %v617_v25 = vpop.permute.xlu1 %616 }
 0x15b   : > { %1293 = vrot.lane.b32.xlu0 %v1292_v23, %s1524_s23  ;;  %v615_v26 = vpop.permute.xlu0 %614 }
 0x15c   : > { %1288 = vrot.lane.b32.xlu1 %v1287_v24, %s1524_s23 }
 0x163   : > { %v539_v27 = vpop.permute.xlu1 %538 }
 0x164   : > { %v663_v42 = vmul.f32 %v615_v26, %v539_v27 }
 0x167   : > { %v541_v28 = vpop.permute.xlu0 %540 }
 0x16b   : > { %v543_v29 = vpop.permute.xlu1 %542 }
 0x16c   : > { %v564_v30 = vsel %vm562_vm8, %v541_v28, %v543_v29  ;;  %v665_v31 = vmul.f32 %v617_v25, %v543_v29 }
 0x16d   : > { %v664_v32 = vmul.f32 %v617_v25, %v564_v30 }
 0x16f   : > { %v1302_v33 = vpack.i.bf16 %v665_v31, %v664_v32 }
 0x171   : > { %1303 = vrot.lane.b32.xlu0 %v1302_v33, %s1524_s23 }
 0x173   : > { %v545_v34 = vpop.permute.xlu0 %544 }
 0x174   : > { %v547_v35 = vpop.permute.xlu1 %546 }
 0x175   : > { %v565_v48 = vsel %vm562_vm8, %v545_v34, %v547_v35 }
 0x17b   : > { %v549_v36 = vpop.permute.xlu0 %548 }
 0x17c   : > { %v551_v37 = vpop.permute.xlu1 %550 }
 0x17d   : > { %v566_v39 = vsel %vm562_vm8, %v549_v36, %v551_v37 }
 0x17f   : > { %v537_v38 = vpop.permute.xlu0 %536 }
 0x180   : > { %v563_v40 = vsel %vm562_vm8, %v537_v38, %v539_v27  ;;  %v621_v41 = vpop.permute.xlu1 %620 }
 0x181   : > { %v662_v45 = vmul.f32 %v615_v26, %v563_v40  ;;  %v668_v46 = vmul.f32 %v621_v41, %v566_v39  ;;  %v669_v47 = vmul.f32 %v621_v41, %v551_v37 }
 0x183   : > { %v1312_v49 = vpack.i.bf16 %v669_v47, %v668_v46  ;;  %v619_v50 = vpop.permute.xlu0 %618  ;;  %v1297_v51 = vpack.i.bf16 %v663_v42, %v662_v45 }
 0x184   : > { %v666_v52 = vmul.f32 %v619_v50, %v565_v48  ;;  %v667_v53 = vmul.f32 %v619_v50, %v547_v35 }
 0x185   : > { %1313 = vrot.lane.b32.xlu0 %v1312_v49, %s1524_s23  ;;  %1298 = vrot.lane.b32.xlu1 %v1297_v51, %s1524_s23 }
 0x186   : > { %v1307_v54 = vpack.i.bf16 %v667_v53, %v666_v52 }
 0x187   : > { %v553_v55 = vpop.permute.xlu0 %552 }
 0x188   : > { %v555_v56 = vpop.permute.xlu1 %554 }
 0x189   : > { %1308 = vrot.lane.b32.xlu1 %v1307_v54, %s1524_s23  ;;  %v567_v59 = vsel %vm562_vm8, %v553_v55, %v555_v56 }
 0x18b   : > { %v557_v57 = vpop.permute.xlu0 %556 }
 0x18c   : > { %v559_v58 = vpop.permute.xlu1 %558 }
 0x18d   : > { %v568_v61 = vsel %vm562_vm8, %v557_v57, %v559_v58 }
 0x18f   : > { %v623_v60 = vpop.permute.xlu0 %622 }
 0x190   : > { %v670_v62 = vmul.f32 %v623_v60, %v567_v59  ;;  %v671_v63 = vmul.f32 %v623_v60, %v555_v56  ;;  %v625_v0 = vpop.permute.xlu1 %624 }
 0x191   : > { %v672_v1 = vmul.f32 %v625_v0, %v568_v61  ;;  %v673_v2 = vmul.f32 %v625_v0, %v559_v58 }
 0x192   : > { %v1317_v43 = vpack.i.bf16 %v671_v63, %v670_v62 }
 0x193   : > { %v1322_v44 = vpack.i.bf16 %v673_v2, %v672_v1  ;;  %v561_v4 = vpop.permute.xlu0 %560 }
 0x194   : > { %v627_v5 = vpop.permute.xlu1 %626  ;;  %1318 = vrot.lane.b32.xlu1 %v1317_v43, %s1524_s23 }
 0x195   : > { %1323 = vrot.lane.b32.xlu0 %v1322_v44, %s1524_s23  ;;  %v674_v7 = vmul.f32 %v627_v5, %v561_v4 }
 0x197   : > { %v629_v6 = vpop.permute.xlu0 %628 }
 0x198   : > { %v675_v8 = vmul.f32 %v629_v6, %v561_v4  ;;  %v1259_v9 = vpop.permute.xlu1 %1258 }
 0x199   : > { %v1261_v11 = vunpack.i.h.bf16 %v1259_v9  ;;  %v1260_v12 = vunpack.i.l.bf16 %v1259_v9 }
 0x19a   : > { %v1327_v10 = vpack.i.bf16 %v675_v8, %v674_v7 }
 0x19b   : > { %v1264_v14 = vpop.permute.xlu0 %1263  ;;  %v768_v18 = vsel %vm767_vm9, %v1260_v12, %v1261_v11 }
 0x19c   : > { %v1266_v15 = vunpack.i.h.bf16 %v1264_v14  ;;  %v1265_v16 = vunpack.i.l.bf16 %v1264_v14  ;;  %1328 = vrot.lane.b32.xlu1 %v1327_v10, %s1524_s23 }
 0x19e   : > { %v769_v19 = vsel %vm767_vm9, %v1265_v16, %v1266_v15  ;;  %v676_v15 = vld [vmem:[#allocation4] sm:$0xff] }
 0x19f   : > { %v1108_v13 = vpack.c.bf16 %v769_v19, %v768_v18 }
 0x1a1   : > { %1109 = vmatpush3.bf16.msra.mxu0 %v1108_v13 }
 0x1a2   : > { %1110 = vmatprep.subr.bf16.mxu0 %v1522_v3 }
 0x1a9   : > { %v1274_v20 = vpop.permute.xlu0 %1273 }
 0x1aa   : > { %v1269_v17 = vpop.permute.xlu1 %1268  ;;  %v1276_v21 = vunpack.i.h.bf16 %v1274_v20  ;;  %v1275_v22 = vunpack.i.l.bf16 %v1274_v20 }
 0x1ab   : > { %v1271_v23 = vunpack.i.h.bf16 %v1269_v17  ;;  %v1270_v24 = vunpack.i.l.bf16 %v1269_v17 }
 0x1ac   : > { %v771_v26 = vsel %vm767_vm9, %v1275_v22, %v1276_v21 }
 0x1ad   : > { %v770_v25 = vsel %vm767_vm9, %v1270_v24, %v1271_v23 }
 0x1ae   : > { %v1111_v27 = vpack.c.bf16 %v771_v26, %v770_v25 }
 0x1b0   : > { %1112 = vmatpush3.bf16.msra.mxu0 %v1111_v27 }
 0x1b1   : > { %1113 = vmatprep.subr.bf16.mxu0 %v1522_v3 }
 0x1b9   : > { %v1284_v28 = vpop.permute.xlu0 %1283 }
 0x1ba   : > { %v1279_v29 = vpop.permute.xlu1 %1278  ;;  %v1286_v30 = vunpack.i.h.bf16 %v1284_v28  ;;  %v1285_v31 = vunpack.i.l.bf16 %v1284_v28 }
 0x1bb   : > { %v1281_v32 = vunpack.i.h.bf16 %v1279_v29  ;;  %v1280_v33 = vunpack.i.l.bf16 %v1279_v29 }
 0x1bc   : > { %v773_v35 = vsel %vm767_vm9, %v1285_v31, %v1286_v30 }
 0x1bd   : > { %v772_v34 = vsel %vm767_vm9, %v1280_v33, %v1281_v32 }
 0x1be   : > { %v1114_v36 = vpack.c.bf16 %v773_v35, %v772_v34 }
 0x1c0   : > { %1115 = vmatpush3.bf16.msra.mxu0 %v1114_v36 }
 0x1c1   : > { %1116 = vmatprep.subr.bf16.mxu0 %v1522_v3 }
 0x1cd   : > { %v1294_v37 = vpop.permute.xlu0 %1293 }
 0x1ce   : > { %v1289_v38 = vpop.permute.xlu1 %1288  ;;  %v1296_v39 = vunpack.i.h.bf16 %v1294_v37  ;;  %v1295_v40 = vunpack.i.l.bf16 %v1294_v37 }
 0x1cf   : > { %v1291_v41 = vunpack.i.h.bf16 %v1289_v38  ;;  %v1290_v42 = vunpack.i.l.bf16 %v1289_v38 }
 0x1d0   : > { %v775_v46 = vsel %vm767_vm9, %v1295_v40, %v1296_v39 }
 0x1d1   : > { %v774_v45 = vsel %vm767_vm9, %v1290_v42, %v1291_v41 }
 0x1d2   : > { %v1117_v47 = vpack.c.bf16 %v775_v46, %v774_v45 }
 0x1d4   : > { %1118 = vmatpush3.bf16.msra.mxu0 %v1117_v47 }
 0x1d5   : > { %1119 = vmatprep.subr.bf16.mxu0 %v1522_v3 }
 0x1e3   : > { %v1304_v48 = vpop.permute.xlu0 %1303 }
 0x1e4   : > { %v1306_v49 = vunpack.i.h.bf16 %v1304_v48  ;;  %v1305_v50 = vunpack.i.l.bf16 %v1304_v48 }
 0x1e6   : > { %v777_v58 = vsel %vm767_vm9, %v1305_v50, %v1306_v49 }
 0x1f7   : > { %v1314_v51 = vpop.permute.xlu0 %1313  ;;  %v1299_v52 = vpop.permute.xlu1 %1298 }
 0x1f8   : > { %v1301_v53 = vunpack.i.h.bf16 %v1299_v52  ;;  %v1300_v54 = vunpack.i.l.bf16 %v1299_v52  ;;  %v1316_v55 = vunpack.i.h.bf16 %v1314_v51  ;;  %v1315_v56 = vunpack.i.l.bf16 %v1314_v51 }
 0x1fa   : > { %v776_v57 = vsel %vm767_vm9, %v1300_v54, %v1301_v53  ;;  %v779_v0 = vsel %vm767_vm9, %v1315_v56, %v1316_v55 }
 0x1fb   : > { %v1309_v59 = vpop.permute.xlu1 %1308  ;;  %v1120_v60 = vpack.c.bf16 %v777_v58, %v776_v57 }
 0x1fc   : > { %v1311_v61 = vunpack.i.h.bf16 %v1309_v59  ;;  %v1310_v62 = vunpack.i.l.bf16 %v1309_v59 }
 0x1fd   : > { %1121 = vmatpush3.bf16.msra.mxu0 %v1120_v60 }
 0x1fe   : > { %1122 = vmatprep.subr.bf16.mxu0 %v1522_v3  ;;  %v778_v63 = vsel %vm767_vm9, %v1310_v62, %v1311_v61 }
 0x1ff   : > { %v1123_v1 = vpack.c.bf16 %v779_v0, %v778_v63 }
 0x201   : > { %1124 = vmatpush3.bf16.msra.mxu0 %v1123_v1 }
 0x202   : > { %1125 = vmatprep.subr.bf16.mxu0 %v1522_v3 }
 0x206   : > { %v1319_v2 = vpop.permute.xlu1 %1318 }
 0x207   : > { %v1321_v43 = vunpack.i.h.bf16 %v1319_v2  ;;  %v1320_v44 = vunpack.i.l.bf16 %v1319_v2  ;;  %v1324_v4 = vpop.permute.xlu0 %1323 }
 0x208   : > { %v1326_v5 = vunpack.i.h.bf16 %v1324_v4  ;;  %v1325_v6 = vunpack.i.l.bf16 %v1324_v4 }
 0x209   : > { %v780_v7 = vsel %vm767_vm9, %v1320_v44, %v1321_v43 }
 0x20a   : > { %v781_v8 = vsel %vm767_vm9, %v1325_v6, %v1326_v5 }
 0x20b   : > { %v1126_v9 = vpack.c.bf16 %v781_v8, %v780_v7 }
 0x20d   : > { %1127 = vmatpush3.bf16.msra.mxu0 %v1126_v9 }
 0x20e   : > { %v1329_v10 = vpop.permute.xlu1 %1328  ;;  %1128 = vmatprep.subr.bf16.mxu0 %v1522_v3 }
 0x20f   : > { %v1331_v11 = vunpack.i.h.bf16 %v1329_v10  ;;  %v1330_v12 = vunpack.i.l.bf16 %v1329_v10 }
 0x211   : > { %v1129_v14 = vpack.c.bf16 %v1331_v11, %v1330_v12 }
 0x213   : > { %1130 = vmatpush3.bf16.msra.mxu0 %v1129_v14 }
 0x216   : > { %1105 = vmatmul.mubr.f32.vlgmr.msra.gmra.mrb[0].mxu0 %v676_v15 }
 0x2e9   : > { %v866_v16 = vpop.f32.mrb[0].mxu0 }
 0x2ea   : > { %870 = vadd.xlane.f32.xlu0 %v866_v16  ;;  %v1106_v18 = vpop.f32.mrb[1].mxu0  ;;  %v874_v19 = vmul.f32 %v866_v16, %v866_v16 }
 0x2ec   : > { %875 = vadd.xlane.f32.xlu1 %v874_v19 }
 0x377   : > { %v871_v3 = vpop.xlane.xlu0 %870 }
 0x378   : > { %873 = vst.msk [vmem:[%s279_s30] sm:$0xff] %vm872_vm10, %v871_v3 }
 0x379   : > { %v876_v13 = vpop.xlane.xlu1 %875 }
 0x37a   : > { %877 = vst.msk [vmem:[%s287_s28] sm:$0xff] %vm872_vm10, %v876_v13 }
 0x37b PF: > { %s19_s22 = sadd.s32 1, %s1491_s22   ;;  %s1974_s10 = sld [smem:[#allocation9_spill]] }
 0x37c   : > { %p16_p1 = scmp.ge.s32.totalorder %s19_s22, 10   ;;  %s1975_s11 = smov %s1988_s15 }
 0x37d   : > { %s1976_s15 = smov %s1467_s16  ;;  %s1977_s16 = smov %s1471_s17 }
 0x37e   : > { %s1978_s17 = smov %s1688_s13  ;;  %s1979_s18 = smov %s1483_s20 }
 0x37f   : > { %s1980_s19 = smov %s1487_s21  ;;  %s1982_s21 = smov %s1975_s11 }
 0x380   :  { %18 = sbr.rel (!%p16_p1) target bundleno = 9 (0x9), region = 92 }
 0x381   : > { %s1981_s20 = smov %s1974_s10 }
 0x387   :  { %927 = vsyncpa [#allocation3], 1 }
 0x388   :  { %929 = vsyncpa [#allocation3 + $0x1], 1 }
 0x389   :  { %930 = vsyncpa [#allocation5], 1 }

</bundles_post_ra>
